<compile_context>
chip_gen: v6e
topology: v6e:2x2x1
jax: 0.10.0
libtpu: 0.0.40
codegen_flags: <defaults>
</compile_context>

<pallas_src>
import functools

import jax
import jax.numpy as jnp
from jax.experimental import pallas as pl
from jax.experimental.pallas import tpu as pltpu


def _up_conv_kernel(xf_ref, w_ref, mask_ref, o_ref, rhs_ref, *, W, HWp, C_in, Bb, Kp):
    # xf_ref:   (Bb, C_in, Lp)        row-padded, flattened, end-padded inputs (Bb images)
    # w_ref:    (4*C_out, Kp)  bf16   phase-fused, BN-folded weights (+ bias column, 0-pad)
    # mask_ref: (2, HWp)       f32    border masks: row 0 for dc==0, row 1 for dc==2
    # o_ref:    (Bb, 4*C_out, HWp)    phase-major output, spatial flattened on lanes
    # rhs_ref:  (Kp, Bb*HWp)   f32    scratch: assembled im2col-on-original RHS
    KT = 9 * C_in

    # --- assemble the fused RHS: 9 sublane-offset stores of contiguous tap slices ---
    for n in range(Bb):
        base = n * HWp
        for dr in range(3):
            for dc in range(3):
                t = dr * 3 + dc
                s = dr * W + dc                           # static lane offset of this tap
                tap = xf_ref[n, :, s:s + HWp]             # (C_in, HWp) contiguous slice
                if dc == 0:                               # zero-pad semantics, left border
                    tap = tap * mask_ref[0:1, :]
                elif dc == 2:                             # zero-pad semantics, right border
                    tap = tap * mask_ref[1:2, :]
                rhs_ref[t * C_in:(t + 1) * C_in, base:base + HWp] = tap

    # Bias row (all ones) + explicit zero tail rows (pad columns of w_ref are zero, but
    # 0 * uninitialized-VMEM could be NaN, so the rows themselves must be finite).
    rhs_ref[KT:KT + 1, :] = jnp.ones((1, Bb * HWp), dtype=jnp.float32)
    if Kp > KT + 1:
        rhs_ref[KT + 1:Kp, :] = jnp.zeros((Kp - KT - 1, Bb * HWp), dtype=jnp.float32)

    # --- one fused bf16 MXU matmul, f32 accumulate, fused bias + ReLU ---
    acc = jnp.dot(w_ref[...], rhs_ref[...].astype(jnp.bfloat16),
                  preferred_element_type=jnp.float32)     # (4*C_out, Bb*HWp)
    y = jnp.maximum(acc, 0.0)

    # Lane-dense stores (HWp is a multiple of 128; per-image lane offsets are too).
    for n in range(Bb):
        o_ref[n] = y[:, n * HWp:(n + 1) * HWp].astype(o_ref.dtype)


def up_conv_forward(x_nchw, w_oihw, b_conv, bn_gamma, bn_beta, bn_mean, bn_var,
                    eps=1e-5, batch_block=None, phase_major=False):
    """Forward pass of up_conv. x_nchw: (N, C_in, H, W) float32 -> (N, C_out, 2H, 2W).

    If phase_major=True, returns the raw kernel layout (N, 4*C_out, H*W) with rows
    ordered (a, b, o) and value out[n, o, 2i+a, 2j+b] at lane i*W+j (skips the
    wrapper-side NCHW interleave for consumers that can fuse it away).
    """
    N, C_in, H, W = x_nchw.shape
    C_out = w_oihw.shape[0]
    HW = H * W
    HWp = ((HW + 127) // 128) * 128                        # lane-dense output guard
    Lp = 2 * W + 2 + HWp                                   # flattened padded input length
    KT = 9 * C_in
    Kp = ((KT + 1 + 7) // 8) * 8                           # taps + bias row, 8-aligned

    # ---- weight prep (tiny one-time transform): fold BN, build phase-fused weights ----
    scale = bn_gamma / jnp.sqrt(bn_var + eps)              # (C_out,)
    shift = (b_conv - bn_mean) * scale + bn_beta           # (C_out,)
    w_s = (w_oihw * scale[:, None, None, None]).astype(jnp.float32)

    # wp[a, b, dr, dc, o, i]: effective weights of phase (a, b) acting on the padded
    # original-resolution input at shift (dr, dc) (nearest-x2 upsample + 3x3 conv).
    wp = jnp.zeros((2, 2, 3, 3, C_out, C_in), dtype=jnp.float32)
    for a in range(2):
        for b in range(2):
            for ky in range(3):
                for kx in range(3):
                    dr = (a + ky + 1) // 2
                    dc = (b + kx + 1) // 2
                    wp = wp.at[a, b, dr, dc].add(w_s[:, :, ky, kx])
    # -> (4*C_out, Kp): row = (a*2+b)*C_out + o, col = (dr*3+dc)*C_in + ci, col KT = bias.
    w_mat = wp.transpose(0, 1, 4, 2, 3, 5).reshape(4 * C_out, KT)
    w_all = jnp.zeros((4 * C_out, Kp), dtype=jnp.float32)
    w_all = w_all.at[:, :KT].set(w_mat)
    w_all = w_all.at[:, KT].set(jnp.tile(shift.astype(jnp.float32), 4))
    w_all = w_all.astype(jnp.bfloat16)                     # bf16 MXU feed

    # ---- input prep: row-pad by 1, flatten spatial, pad flat axis (no 4x tensor) ----
    xr = jnp.pad(x_nchw.astype(jnp.float32), ((0, 0), (0, 0), (1, 1), (0, 0)))
    xf = xr.reshape(N, C_in, (H + 2) * W)
    xf = jnp.pad(xf, ((0, 0), (0, 0), (1, Lp - (H + 2) * W - 1)))   # (N, C_in, Lp)

    # Border masks for the flattened taps (column zero-padding emulation).
    col = jnp.arange(HWp, dtype=jnp.int32) % W
    mask = jnp.stack([(col != 0), (col != W - 1)]).astype(jnp.float32)  # (2, HWp)

    # ---- pick images-per-grid-step: amortize per-step overhead (v5e/v6e) while keeping
    #      >= 2 "parallel" steps whenever N >= 2 so both v7x TensorCores are fed. ----
    def _step_vmem_bytes(bb):
        return (2 * bb * C_in * Lp * 4              # double-buffered input blocks
                + 2 * bb * 4 * C_out * HWp * 4      # double-buffered output blocks
                + Kp * bb * HWp * 4                 # RHS scratch
                + 2 * 4 * C_out * Kp * 2            # weights (bf16)
                + 2 * 2 * HWp * 4)                  # masks

    if batch_block is None:
        batch_block = max(1, N // 2)
        while batch_block > 1 and (N % batch_block != 0
                                   or _step_vmem_bytes(batch_block) > (8 << 20)):
            batch_block -= 1
    if N % batch_block != 0:
        raise ValueError(f"batch_block={batch_block} must divide N={N}")
    Bb = batch_block
    steps = N // Bb

    kernel = functools.partial(_up_conv_kernel, W=W, HWp=HWp, C_in=C_in, Bb=Bb, Kp=Kp)

    out = pl.pallas_call(
        kernel,
        out_shape=jax.ShapeDtypeStruct((N, 4 * C_out, HWp), jnp.float32),
        grid_spec=pltpu.PrefetchScalarGridSpec(
            num_scalar_prefetch=0,
            grid=(steps,),
            in_specs=[
                pl.BlockSpec((Bb, C_in, Lp), lambda n: (n, 0, 0)),
                pl.BlockSpec((4 * C_out, Kp), lambda n: (0, 0)),
                pl.BlockSpec((2, HWp), lambda n: (0, 0)),
            ],
            out_specs=pl.BlockSpec((Bb, 4 * C_out, HWp), lambda n: (n, 0, 0)),
            scratch_shapes=[pltpu.VMEM((Kp, Bb * HWp), jnp.float32)],
        ),
        compiler_params=pltpu.CompilerParams(
            dimension_semantics=("parallel",)),
    )(xf, w_all, mask)

    out = out[:, :, :HW]                                   # drop lane padding (no-op here)
    if phase_major:
        return out

    # TODO(synk): fuse this interleave into the consumer or an in-kernel XLU swizzle.
    # Interleave phases back to NCHW: [n, (a,b,o), i*W+j] -> [n, o, 2i+a, 2j+b]
    out = out.reshape(N, 2, 2, C_out, H, W).transpose(0, 3, 4, 1, 5, 2)
    return out.reshape(N, C_out, 2 * H, 2 * W)


def _reference(x_nchw, w_oihw, b_conv, bn_gamma, bn_beta, bn_mean, bn_var, eps=1e-5):
    """Pure-JAX reference mirroring the PyTorch module (BN in eval mode)."""
    x = jnp.repeat(jnp.repeat(x_nchw, 2, axis=2), 2, axis=3)        # nearest x2, NCHW
    y = jax.lax.conv_general_dilated(
        x, w_oihw, window_strides=(1, 1), padding=((1, 1), (1, 1)),
        dimension_numbers=("NCHW", "OIHW", "NCHW"))
    y = y + b_conv[None, :, None, None]
    y = (y - bn_mean[None, :, None, None]) / jnp.sqrt(bn_var[None, :, None, None] + eps)
    y = y * bn_gamma[None, :, None, None] + bn_beta[None, :, None, None]
    return jnp.maximum(y, 0.0)


if __name__ == "__main__":
    key = jax.random.PRNGKey(0)
    k_x, k_w, k_b, k_g, k_bt = jax.random.split(key, 5)

    N, C_in, C_out, H, W = 2, 4, 8, 16, 16                          # output spatial: 32x32

    x = jax.random.normal(k_x, (N, C_in, H, W), dtype=jnp.float32)
    w = jax.random.normal(k_w, (C_out, C_in, 3, 3), dtype=jnp.float32) * 0.1
    b = jax.random.normal(k_b, (C_out,), dtype=jnp.float32) * 0.1
    gamma = 1.0 + 0.1 * jax.random.normal(k_g, (C_out,), dtype=jnp.float32)
    beta = 0.1 * jax.random.normal(k_bt, (C_out,), dtype=jnp.float32)
    # Fresh nn.BatchNorm2d running stats (inference-mode semantics).
    run_mean = jnp.zeros((C_out,), dtype=jnp.float32)
    run_var = jnp.ones((C_out,), dtype=jnp.float32)

    ref = _reference(x, w, b, gamma, beta, run_mean, run_var)

    # Default: 1 image / step, grid=(2,) "parallel" (feeds both v7x TensorCores).
    out = up_conv_forward(x, w, b, gamma, beta, run_mean, run_var)
    out = jax.block_until_ready(out)
    assert out.shape == (N, C_out, 2 * H, 2 * W), out.shape
    assert jnp.allclose(out, ref, atol=2e-2, rtol=2e-2), float(jnp.abs(out - ref).max())

    # Batched path: whole batch in one grid step (wide Bb*H*W-lane RHS, v5e/v6e mode).
    out_b = up_conv_forward(x, w, b, gamma, beta, run_mean, run_var, batch_block=N)
    out_b = jax.block_until_ready(out_b)
    assert jnp.allclose(out_b, ref, atol=2e-2, rtol=2e-2), float(jnp.abs(out_b - ref).max())

    print("KERNEL_OK")
</pallas_src>

<mosaic_0001>
module attributes {stable_mosaic.version = 11 : i64} {
  func.func @_up_conv_kernel(%arg0: i32, %arg1: memref<1x4x290xf32, #tpu.memory_space<vmem>>, %arg2: memref<32x40xbf16, #tpu.memory_space<vmem>>, %arg3: memref<2x256xf32, #tpu.memory_space<vmem>>, %arg4: memref<1x32x256xf32, #tpu.memory_space<vmem>>, %arg5: memref<40x256xf32, #tpu.memory_space<vmem>>) attributes {dimension_semantics = [#tpu.dimension_semantics<parallel>], iteration_bounds = array<i64: 2>, scalar_prefetch = 0 : i64, scratch_operands = 1 : i64, tpu.core_type = #tpu.core_type<tc>, window_params = [{transform_indices = @transform_0, window_bounds = array<i64: 1, 4, 290>}, {pipeline_mode = #tpu.pipeline_mode<synchronous>, transform_indices = @transform_1, window_bounds = array<i64: 32, 40>}, {pipeline_mode = #tpu.pipeline_mode<synchronous>, transform_indices = @transform_2, window_bounds = array<i64: 2, 256>}, {transform_indices = @transform_3, window_bounds = array<i64: 1, 32, 256>}]} {
    %c0 = arith.constant 0 : index
    %c0_0 = arith.constant 0 : index
    %c0_1 = arith.constant 0 : index
    %0 = vector.load %arg1[%c0, %c0_0, %c0_1] : memref<1x4x290xf32, #tpu.memory_space<vmem>>, vector<1x4x256xf32>
    %1 = vector.shape_cast %0 : vector<1x4x256xf32> to vector<4x256xf32>
    %c0_2 = arith.constant 0 : index
    %c0_3 = arith.constant 0 : index
    %2 = vector.load %arg3[%c0_2, %c0_3] : memref<2x256xf32, #tpu.memory_space<vmem>>, vector<1x256xf32>
    %3 = vector.broadcast %2 : vector<1x256xf32> to vector<4x256xf32>
    %4 = arith.mulf %1, %3 : vector<4x256xf32>
    %c0_4 = arith.constant 0 : index
    %c0_5 = arith.constant 0 : index
    %5 = vector.load %arg5[%c0_4, %c0_5] : memref<40x256xf32, #tpu.memory_space<vmem>>, vector<4x256xf32>
    tpu.vector_store %arg5[%c0_4, %c0_5], %4 {strides = array<i32>} : memref<40x256xf32, #tpu.memory_space<vmem>>, vector<4x256xf32>,
    %c0_6 = arith.constant 0 : index
    %c0_7 = arith.constant 0 : index
    %c1 = arith.constant 1 : index
    %6 = vector.load %arg1[%c0_6, %c0_7, %c1] : memref<1x4x290xf32, #tpu.memory_space<vmem>>, vector<1x4x256xf32>
    %7 = vector.shape_cast %6 : vector<1x4x256xf32> to vector<4x256xf32>
    %c4 = arith.constant 4 : index
    %c0_8 = arith.constant 0 : index
    %8 = vector.load %arg5[%c4, %c0_8] : memref<40x256xf32, #tpu.memory_space<vmem>>, vector<4x256xf32>
    tpu.vector_store %arg5[%c4, %c0_8], %7 {strides = array<i32>} : memref<40x256xf32, #tpu.memory_space<vmem>>, vector<4x256xf32>,
    %c0_9 = arith.constant 0 : index
    %c0_10 = arith.constant 0 : index
    %c2 = arith.constant 2 : index
    %9 = vector.load %arg1[%c0_9, %c0_10, %c2] : memref<1x4x290xf32, #tpu.memory_space<vmem>>, vector<1x4x256xf32>
    %10 = vector.shape_cast %9 : vector<1x4x256xf32> to vector<4x256xf32>
    %c1_11 = arith.constant 1 : index
    %c0_12 = arith.constant 0 : index
    %11 = vector.load %arg3[%c1_11, %c0_12] : memref<2x256xf32, #tpu.memory_space<vmem>>, vector<1x256xf32>
    %12 = vector.broadcast %11 : vector<1x256xf32> to vector<4x256xf32>
    %13 = arith.mulf %10, %12 : vector<4x256xf32>
    %c8 = arith.constant 8 : index
    %c0_13 = arith.constant 0 : index
    %14 = vector.load %arg5[%c8, %c0_13] : memref<40x256xf32, #tpu.memory_space<vmem>>, vector<4x256xf32>
    tpu.vector_store %arg5[%c8, %c0_13], %13 {strides = array<i32>} : memref<40x256xf32, #tpu.memory_space<vmem>>, vector<4x256xf32>,
    %c0_14 = arith.constant 0 : index
    %c0_15 = arith.constant 0 : index
    %c16 = arith.constant 16 : index
    %15 = vector.load %arg1[%c0_14, %c0_15, %c16] : memref<1x4x290xf32, #tpu.memory_space<vmem>>, vector<1x4x256xf32>
    %16 = vector.shape_cast %15 : vector<1x4x256xf32> to vector<4x256xf32>
    %c0_16 = arith.constant 0 : index
    %c0_17 = arith.constant 0 : index
    %17 = vector.load %arg3[%c0_16, %c0_17] : memref<2x256xf32, #tpu.memory_space<vmem>>, vector<1x256xf32>
    %18 = vector.broadcast %17 : vector<1x256xf32> to vector<4x256xf32>
    %19 = arith.mulf %16, %18 : vector<4x256xf32>
    %c12 = arith.constant 12 : index
    %c0_18 = arith.constant 0 : index
    %20 = vector.load %arg5[%c12, %c0_18] : memref<40x256xf32, #tpu.memory_space<vmem>>, vector<4x256xf32>
    tpu.vector_store %arg5[%c12, %c0_18], %19 {strides = array<i32>} : memref<40x256xf32, #tpu.memory_space<vmem>>, vector<4x256xf32>,
    %c0_19 = arith.constant 0 : index
    %c0_20 = arith.constant 0 : index
    %c17 = arith.constant 17 : index
    %21 = vector.load %arg1[%c0_19, %c0_20, %c17] : memref<1x4x290xf32, #tpu.memory_space<vmem>>, vector<1x4x256xf32>
    %22 = vector.shape_cast %21 : vector<1x4x256xf32> to vector<4x256xf32>
    %c16_21 = arith.constant 16 : index
    %c0_22 = arith.constant 0 : index
    %23 = vector.load %arg5[%c16_21, %c0_22] : memref<40x256xf32, #tpu.memory_space<vmem>>, vector<4x256xf32>
    tpu.vector_store %arg5[%c16_21, %c0_22], %22 {strides = array<i32>} : memref<40x256xf32, #tpu.memory_space<vmem>>, vector<4x256xf32>,
    %c0_23 = arith.constant 0 : index
    %c0_24 = arith.constant 0 : index
    %c18 = arith.constant 18 : index
    %24 = vector.load %arg1[%c0_23, %c0_24, %c18] : memref<1x4x290xf32, #tpu.memory_space<vmem>>, vector<1x4x256xf32>
    %25 = vector.shape_cast %24 : vector<1x4x256xf32> to vector<4x256xf32>
    %c1_25 = arith.constant 1 : index
    %c0_26 = arith.constant 0 : index
    %26 = vector.load %arg3[%c1_25, %c0_26] : memref<2x256xf32, #tpu.memory_space<vmem>>, vector<1x256xf32>
    %27 = vector.broadcast %26 : vector<1x256xf32> to vector<4x256xf32>
    %28 = arith.mulf %25, %27 : vector<4x256xf32>
    %c20 = arith.constant 20 : index
    %c0_27 = arith.constant 0 : index
    %29 = vector.load %arg5[%c20, %c0_27] : memref<40x256xf32, #tpu.memory_space<vmem>>, vector<4x256xf32>
    tpu.vector_store %arg5[%c20, %c0_27], %28 {strides = array<i32>} : memref<40x256xf32, #tpu.memory_space<vmem>>, vector<4x256xf32>,
    %c0_28 = arith.constant 0 : index
    %c0_29 = arith.constant 0 : index
    %c32 = arith.constant 32 : index
    %30 = vector.load %arg1[%c0_28, %c0_29, %c32] : memref<1x4x290xf32, #tpu.memory_space<vmem>>, vector<1x4x256xf32>
    %31 = vector.shape_cast %30 : vector<1x4x256xf32> to vector<4x256xf32>
    %c0_30 = arith.constant 0 : index
    %c0_31 = arith.constant 0 : index
    %32 = vector.load %arg3[%c0_30, %c0_31] : memref<2x256xf32, #tpu.memory_space<vmem>>, vector<1x256xf32>
    %33 = vector.broadcast %32 : vector<1x256xf32> to vector<4x256xf32>
    %34 = arith.mulf %31, %33 : vector<4x256xf32>
    %c24 = arith.constant 24 : index
    %c0_32 = arith.constant 0 : index
    %35 = vector.load %arg5[%c24, %c0_32] : memref<40x256xf32, #tpu.memory_space<vmem>>, vector<4x256xf32>
    tpu.vector_store %arg5[%c24, %c0_32], %34 {strides = array<i32>} : memref<40x256xf32, #tpu.memory_space<vmem>>, vector<4x256xf32>,
    %c0_33 = arith.constant 0 : index
    %c0_34 = arith.constant 0 : index
    %c33 = arith.constant 33 : index
    %36 = vector.load %arg1[%c0_33, %c0_34, %c33] : memref<1x4x290xf32, #tpu.memory_space<vmem>>, vector<1x4x256xf32>
    %37 = vector.shape_cast %36 : vector<1x4x256xf32> to vector<4x256xf32>
    %c28 = arith.constant 28 : index
    %c0_35 = arith.constant 0 : index
    %38 = vector.load %arg5[%c28, %c0_35] : memref<40x256xf32, #tpu.memory_space<vmem>>, vector<4x256xf32>
    tpu.vector_store %arg5[%c28, %c0_35], %37 {strides = array<i32>} : memref<40x256xf32, #tpu.memory_space<vmem>>, vector<4x256xf32>,
    %c0_36 = arith.constant 0 : index
    %c0_37 = arith.constant 0 : index
    %c34 = arith.constant 34 : index
    %39 = vector.load %arg1[%c0_36, %c0_37, %c34] : memref<1x4x290xf32, #tpu.memory_space<vmem>>, vector<1x4x256xf32>
    %40 = vector.shape_cast %39 : vector<1x4x256xf32> to vector<4x256xf32>
    %c1_38 = arith.constant 1 : index
    %c0_39 = arith.constant 0 : index
    %41 = vector.load %arg3[%c1_38, %c0_39] : memref<2x256xf32, #tpu.memory_space<vmem>>, vector<1x256xf32>
    %42 = vector.broadcast %41 : vector<1x256xf32> to vector<4x256xf32>
    %43 = arith.mulf %40, %42 : vector<4x256xf32>
    %c32_40 = arith.constant 32 : index
    %c0_41 = arith.constant 0 : index
    %44 = vector.load %arg5[%c32_40, %c0_41] : memref<40x256xf32, #tpu.memory_space<vmem>>, vector<4x256xf32>
    tpu.vector_store %arg5[%c32_40, %c0_41], %43 {strides = array<i32>} : memref<40x256xf32, #tpu.memory_space<vmem>>, vector<4x256xf32>,
    %cst = arith.constant 1.000000e+00 : f32
    %45 = vector.broadcast %cst : f32 to vector<1x256xf32>
    %c36 = arith.constant 36 : index
    %c0_42 = arith.constant 0 : index
    %46 = vector.load %arg5[%c36, %c0_42] : memref<40x256xf32, #tpu.memory_space<vmem>>, vector<1x256xf32>
    tpu.vector_store %arg5[%c36, %c0_42], %45 {strides = array<i32>} : memref<40x256xf32, #tpu.memory_space<vmem>>, vector<1x256xf32>,
    %cst_43 = arith.constant 0.000000e+00 : f32
    %47 = vector.broadcast %cst_43 : f32 to vector<3x256xf32>
    %c37 = arith.constant 37 : index
    %c0_44 = arith.constant 0 : index
    %48 = vector.load %arg5[%c37, %c0_44] : memref<40x256xf32, #tpu.memory_space<vmem>>, vector<3x256xf32>
    tpu.vector_store %arg5[%c37, %c0_44], %47 {strides = array<i32>} : memref<40x256xf32, #tpu.memory_space<vmem>>, vector<3x256xf32>,
    %c0_45 = arith.constant 0 : index
    %c0_46 = arith.constant 0 : index
    %49 = vector.load %arg2[%c0_45, %c0_46] : memref<32x40xbf16, #tpu.memory_space<vmem>>, vector<32x40xbf16>
    %c0_47 = arith.constant 0 : index
    %c0_48 = arith.constant 0 : index
    %50 = vector.load %arg5[%c0_47, %c0_48] : memref<40x256xf32, #tpu.memory_space<vmem>>, vector<40x256xf32>
    %51 = arith.truncf %50 : vector<40x256xf32> to vector<40x256xbf16>
    %cst_49 = arith.constant dense<0.000000e+00> : vector<32x256xf32>
    %52 = tpu.matmul %49, %51, %cst_49 {dimension_numbers = #tpu.dot_dimension_numbers<[1], [0], [0], [1], [0, 0, 1, 1], [], []>} : vector<32x40xbf16>, vector<40x256xbf16>, vector<32x256xf32> -> vector<32x256xf32>
    %cst_50 = arith.constant 0.000000e+00 : f32
    %53 = vector.broadcast %cst_50 : f32 to vector<32x256xf32>
    %54 = arith.maximumf %52, %53 : vector<32x256xf32>
    %c0_51 = arith.constant 0 : index
    %c0_52 = arith.constant 0 : index
    %c0_53 = arith.constant 0 : index
    %55 = vector.load %arg4[%c0_51, %c0_52, %c0_53] : memref<1x32x256xf32, #tpu.memory_space<vmem>>, vector<1x32x256xf32>
    %56 = vector.shape_cast %55 : vector<1x32x256xf32> to vector<32x256xf32>
    %57 = vector.shape_cast %54 : vector<32x256xf32> to vector<1x32x256xf32>
    tpu.vector_store %arg4[%c0_51, %c0_52, %c0_53], %57 {strides = array<i32>} : memref<1x32x256xf32, #tpu.memory_space<vmem>>, vector<1x32x256xf32>,
    return
  }
  func.func @transform_0(%arg0: i32) -> (i32, i32, i32) {
    %c0_i32 = arith.constant 0 : i32
    %c0_i32_0 = arith.constant 0 : i32
    %c0_i32_1 = arith.constant 0 : i32
    return %arg0, %c0_i32, %c0_i32_0 : i32, i32, i32
  }
  func.func @transform_1(%arg0: i32) -> (i32, i32) {
    %c0_i32 = arith.constant 0 : i32
    %c0_i32_0 = arith.constant 0 : i32
    %c0_i32_1 = arith.constant 0 : i32
    return %c0_i32, %c0_i32_0 : i32, i32
  }
  func.func @transform_2(%arg0: i32) -> (i32, i32) {
    %c0_i32 = arith.constant 0 : i32
    %c0_i32_0 = arith.constant 0 : i32
    %c0_i32_1 = arith.constant 0 : i32
    return %c0_i32, %c0_i32_0 : i32, i32
  }
  func.func @transform_3(%arg0: i32) -> (i32, i32, i32) {
    %c0_i32 = arith.constant 0 : i32
    %c0_i32_0 = arith.constant 0 : i32
    %c0_i32_1 = arith.constant 0 : i32
    return %arg0, %c0_i32, %c0_i32_0 : i32, i32, i32
  }
}

</mosaic_0001>

<bundles_post_ra>
// kernel: tpu_custom_call.1
= control target key start
LH: loop header
LB: loop body
LE: loop exit
PB: predicated region body
PF: predicated region fallthrough
CT: control target
= control target key end

     0   :  { %8 = vsyncpa [#allocation4], 0  ;;  %s1263_s0 = inlined_call_operand.hbm [shape: f32[2,4,290], index: 0, kind: input, shape index: {}]   ;;  %s1264_s1 = inlined_call_operand.hbm [shape: bf16[32,40], index: 1, kind: input, shape index: {}]   ;;  %s1265_s2 = inlined_call_operand.hbm [shape: f32[2,256], index: 2, kind: input, shape index: {}]   ;;  %s1266_s3 = inlined_call_operand.hbm [shape: f32[2,32,256], index: 3, kind: output, shape index: {}]  }
   0x1   :  { %10 = vsyncpa [#allocation4 + $0x1], 0 }
   0x2   :  { %11 = vsyncpa [#allocation7], 0 }
   0x3   :  { %12 = vsyncpa [#allocation5], 0 }
   0x4   :  { %14 = vsyncpa [#allocation5 + $0x1], 0  ;;  %s1026_s12 = smov 0   ;;  %s1028_s13 = smov 0  }
   0x5   :  { %s1030_s14 = smov 0   ;;  %s1032_s15 = smov 0  }
   0x6 LB: > { %s1047_s16 = sadd.s32 4294967295, %s981_s15   ;;  %s711_s17 = sadd.s32 4294967294, %s981_s15   ;;  %s981_s15 = sphi %s1032_s15, %s1288_s15   ;;  %s977_s14 = sphi %s1030_s14, %s1287_s14   ;;  %s973_s13 = sphi %s1028_s13, %s1286_s13   ;;  %s969_s12 = sphi %s1026_s12, %s1285_s12  }
   0x7   : > { %p40_p0 = scmp.ne.s32.totalorder %s973_s13, %s969_s12  ;;  %p1267_p1 = scmp.eq.s32.totalorder %s1047_s16, 0 }
   0x8   : > { %p112_p3 = scmp.eq.s32.totalorder %s711_s17, 1  ;;  %p712_p5 = scmp.ge.s32.totalorder %s981_s15, 1 }
   0x9   : > { %p1056_p4 = por %p1267_p1, %p40_p0  ;;  %p119_p7 = scmp.lt.s32.totalorder %s981_s15, 3 }
   0xa   : > { %p1061_p6 = por %p112_p3, %p40_p0  ;;  %s983_s21 = smov [#allocation6]  }
   0xb   : > { %s1271_s18 = scalar_select %p1056_p4, 1, 0 }
   0xc   : > { %s1272_s19 = scalar_select %p1061_p6, 1, 0 }
   0xd   : > { %p1066_p8 = pnand %p712_p5, %p119_p7  ;;  %s131_s22 = sshll.u32 %s983_s21, 4  ;;  %s132_s22 = int_to_ptr.vmem [resolvable:$true] %s131_s22 }
   0xe   : > { %s984_s24 = smov [#allocation8]   ;;  %s844_s26 = scalar_lea.vmem %s132_s22, 256 }
   0xf   : > { %s1273_s20 = scalar_select %p1066_p8, 1, 0 }
  0x10   : > { %p753_p9 = pneg %p1066_p8  ;;  %s145_s25 = sshll.u32 %s984_s24, 4  ;;  %s146_s25 = int_to_ptr.vmem [resolvable:$true] %s145_s25 }
  0x11   : > { %p845_p13 = scmp.ne.s32.totalorder %s132_s22, %s844_s26  ;;  %p852_p5 = scmp.lt.s32.totalorder %s132_s22, %s132_s22 }
  0x12   : > { %p1075_p11 = pnand %p753_p9, %p1267_p1  ;;  %p853_p7 = scmp.lt.s32.totalorder %s844_s26, %s844_s26 }
  0x14   : > { %p835_p12 = pneg %p1075_p11  ;;  %p854_p10 = por %p853_p7, %p852_p5 }
  0x16   : > { %p847_p0 = pnand %p845_p13, %p835_p12 }
  0x18   : > { %p848_p3 = pneg %p847_p0 }
  0x1a   : > { %p855_p9 = pnand %p854_p10, %p848_p3 }
  0x1c   : > { %858 = shalt.err (!%p855_p9)
}
  0x1d   : > { %s985_s27 = smov 64   ;;  %s986_s28 = smov 4  }
  0x1e   : > { %756 = dma.hbm_to_vmem [thread:$0]  (!%p1075_p11), %s1264_s1, 256, %s132_s22, [#allocation7], %s985_s27, %s985_s27, %s986_s28  }
  0x1f   : > { %s870_s4 = scalar_lea.vmem %s146_s25, 64  ;;  %p878_p2 = scmp.lt.s32.totalorder %s146_s25, %s146_s25 }
  0x20   : > { %p871_p1 = scmp.ne.s32.totalorder %s146_s25, %s870_s4  ;;  %p879_p6 = scmp.lt.s32.totalorder %s870_s4, %s870_s4 }
  0x22   : > { %p873_p13 = pnand %p871_p1, %p835_p12  ;;  %p880_p5 = por %p879_p6, %p878_p2 }
  0x24   : > { %p874_p0 = pneg %p873_p13 }
  0x26   : > { %p881_p10 = pnand %p880_p5, %p874_p0 }
  0x28   : > { %884 = shalt.err (!%p881_p10)
}
  0x29   : > { %759 = dma.hbm_to_vmem [thread:$0]  (!%p1075_p11), %s1265_s2, 64, %s146_s25, [#allocation7]  }
  0x2a   : > { %s1098_s7 = sadd.s32 1, %s981_s15   ;;  %s27_s8 = sadd.s32 1, %s977_s14 }
  0x2b   : > { %s24_s9 = ssub.s32 %s981_s15, %s1098_s7  ;;  %p34_p1 = scmp.ne.s32.totalorder %s977_s14, %s973_s13 }
  0x2c   : > { %p25_p2 = scmp.eq.s32.totalorder %s24_s9, 0  ;;  %p35_p6 = scmp.eq.s32.totalorder %s981_s15, 0 }
  0x2d   : > { %p1275_p12 = scmp.eq.s32.totalorder %s1047_s16, 1  ;;  %p770_p7 = scmp.lt.s32.totalorder %s981_s15, 2 }
  0x2e   : > { %s1114_s11 = scalar_select %p25_p2, %s977_s14, %s27_s8  }
  0x2f   : > { %p1108_p3 = por %p1275_p12, %p34_p1  ;;  %p36_p9 = por %p35_p6, %p34_p1 }
  0x30   : > { %s156_s17 = sand.u32 1, %s977_s14   ;;  %s739_s22 = smul.u32 192, %s981_s15 }
  0x31   : > { %s1276_s10 = scalar_select %p1108_p3, 1, 0 }
  0x32   : > { %s738_s21 = smul.u32 12, %s156_s17  ;;  %p1118_p11 = pnand %p770_p7, %p36_p9 }
  0x33   : > { %s1125_s26 = scalar_lea.hbm %s1263_s0, %s739_s22  ;;  %s157_s29 = scalar_lea.sflag [#allocation4], %s156_s17 }
  0x34   : > { %s160_s27 = scalar_lea.vmem [#allocation3], %s738_s21  ;;  %s885_s30 = scalar_lea.hbm %s1125_s26, 192 }
  0x35   : > { %s168_s28 = sshll.u32 %s160_s27, 4  ;;  %p886_p13 = scmp.ne.s32.totalorder %s1125_s26, %s885_s30  ;;  %s169_s28 = int_to_ptr.vmem [resolvable:$true] %s168_s28 }
  0x36   : > { %p887_p0 = pneg %p1118_p11  ;;  %s890_s6 = scalar_lea.hbm %s1263_s0, 384 }
  0x37   : > { %p891_p1 = scmp.lt.s32.totalorder %s1125_s26, %s1263_s0  ;;  %p892_p2 = scmp.lt.s32.totalorder %s890_s6, %s885_s30 }
  0x38   : > { %p888_p5 = pnand %p887_p0, %p886_p13 }
  0x39   : > { %p893_p6 = por %p892_p2, %p891_p1 }
  0x3a   : > { %p889_p10 = pneg %p888_p5 }
  0x3c   : > { %p894_p12 = pnand %p893_p6, %p889_p10 }
  0x3e   : > { %897 = shalt.err (!%p894_p12)
}
  0x3f   : > { %s898_s21 = scalar_lea.vmem %s169_s28, 192  ;;  %s987_s17 = smov [#allocation3]  }
  0x40   : > { %p899_p7 = scmp.ne.s32.totalorder %s169_s28, %s898_s21  ;;  %s903_s22 = sshll.u32 %s987_s17, 4  ;;  %s904_s22 = int_to_ptr.vmem [resolvable:$false] %s903_s22 }
  0x41   : > { %s905_s24 = scalar_lea.vmem %s904_s22, 384  ;;  %p906_p13 = scmp.lt.s32.totalorder %s169_s28, %s904_s22 }
  0x42   : > { %p901_p9 = pnand %p899_p7, %p887_p0  ;;  %p907_p5 = scmp.lt.s32.totalorder %s905_s24, %s898_s21 }
  0x44   : > { %p902_p3 = pneg %p901_p9  ;;  %p908_p4 = por %p907_p5, %p906_p13 }
  0x46   : > { %p909_p8 = pnand %p908_p4, %p902_p3 }
  0x48   : > { %912 = shalt.err (!%p909_p8)
}
  0x49   : > { %763 = dma.hbm_to_vmem [thread:$0]  (!%p1118_p11), %s1125_s26, 192, %s169_s28, %s157_s29  }
  0x4a   : > { %p1278_p10 = scmp.ne.s32.totalorder %s1273_s20, 0 }
  0x4b   : > { %s1144_s25 = sand.u32 (!%p1278_p10), 1, %s973_s13   ;;  %p1279_p0 = scmp.ne.s32.totalorder (!%p1278_p10), %s1271_s18, 0 }
  0x4c   : > { %177 = sbr.rel (%p1278_p10) target bundleno = 586 (0x24a), region = 32  ;;  %s180_s30 = scalar_lea.sflag (!%p1278_p10), [#allocation4], %s1144_s25 }
  0x4d   : > { %s740_s27 = smul.u32 (!%p1278_p10), 12, %s1144_s25 }
  0x4f   : > { %s1148_s4 = scalar_lea.vmem (!%p1278_p10), [#allocation3], %s740_s27 }
  0x51   : > { %956 = dma.done.wait (%p1279_p0), %s180_s30, 192  }
  0x52   : > { %958 = vsyncadd (%p1279_p0), %s180_s30, 4294967104  ;;  %p1280_p4 = scmp.eq.s32.totalorder %s1047_s16, 0 }
  0x54   : > { %960 = dma.done.wait (%p1280_p4), [#allocation7], 320   ;;  %p1281_p8 = pmov %p1280_p4 }
  0x55   : > { %v218_v0 = vlaneseq  ;;  %v988_v2 = vmov 1.0   ;;  %v447_v5 = vld [vmem:[#allocation8 + $0x1] ss:$2 sm:$0x3]  ;;  %s989_s18 = smov 34   ;;  %s990_s20 = smov 18  }
  0x56   : > { %962 = vsyncadd (%p1281_p8), [#allocation7], 4294966976  ;;  %v216_v6 = vld [vmem:[#allocation8] ss:$2 sm:$0x3]  ;;  %s991_s23 = smov 32  }
  0x57   : > { %v219_v1 = vshrl.u32 %v218_v0, 7  ;;  %vm485_vm0 = vcmp.lt.s32.totalorder %v218_v0, 256  ;;  %v351_v11 = vld [vmem:[#allocation8 + $0x1] ss:$2 sm:$0x3]  ;;  %s992_s26 = smov 2  }
  0x58   : > { %488 = vst.msk [vmem:[#allocation2 + $0x44] ss:$8 sm:$0x3] %vm485_vm0, %v988_v2  ;;  %v390_v12 = vld [vmem:[#allocation8] ss:$2 sm:$0x3] }
  0x59   : > { %v220_v3 = vsub.s32 0, %v219_v1  ;;  %v224_v4 = vsub.s32 1, %v219_v1  ;;  %v256_v17 = vld [vmem:[#allocation8 + $0x1] ss:$2 sm:$0x3]  ;;  %v1159_v29 = vld [vmem:[%s1148_s4] sm:$0xff] }
  0x5a   : > { %v294_v18 = vld [vmem:[#allocation8] ss:$2 sm:$0x3]  ;;  %s993_s28 = smov 16   ;;  %v335_v31 = vcombine.high %v1159_v29, %v1159_v29  ;;  %s994_s29 = smov 111   ;;  %v430_v33 = vcombine.low %v1159_v29, %v1159_v29  ;;  %vm365_vm1 = vcmask 146432  }
  0x5b   : > { %v452_v7 = vrot.slane %v447_v5, %v220_v3  ;;  %v456_v8 = vrot.slane %v447_v5, %v224_v4  ;;  %v221_v9 = vrot.slane %v216_v6, %v220_v3  ;;  %v225_v10 = vrot.slane %v216_v6, %v224_v4  ;;  %v332_v30 = vld [vmem:[%s1148_s4 + $0x8] sm:$0xf]  ;;  %s995_s5 = smov 95   ;;  %s996_s6 = smov 127  }
  0x5c   : > { %v356_v13 = vrot.slane %v351_v11, %v220_v3  ;;  %v360_v14 = vrot.slane %v351_v11, %v224_v4  ;;  %v395_v15 = vrot.slane %v390_v12, %v220_v3  ;;  %v399_v16 = vrot.slane %v390_v12, %v224_v4  ;;  %v829_v32 = vld [vmem:[%s1148_s4 + $0x8] ss:$0 sps:$4 sm:$0xff]   ;;  %s997_s8 = smov 94   ;;  %s998_s9 = smov 110  }
  0x5d   : > { %v457_v19 = vcombine.low %v452_v7, %v456_v8  ;;  %v226_v20 = vcombine.low %v221_v9, %v225_v10  ;;  %v261_v21 = vrot.slane %v256_v17, %v220_v3  ;;  %v265_v22 = vrot.slane %v256_v17, %v224_v4  ;;  %v830_v34 = vld [vmem:[%s1148_s4 + $0x8] ss:$0 sps:$4 sm:$0xff]   ;;  %s1000_s21 = smov 96   ;;  %s1001_s17 = smov 126  }
  0x5e   : > { %v361_v23 = vcombine.low %v356_v13, %v360_v14  ;;  %v400_v24 = vcombine.low %v395_v15, %v399_v16  ;;  %v299_v25 = vrot.slane %v294_v18, %v220_v3  ;;  %v303_v26 = vrot.slane %v294_v18, %v224_v4  ;;  %v446_v38 = vld [vmem:[%s1148_s4 + $0x8] sm:$0xf]  ;;  %s1002_s22 = smov 112   ;;  %s720_s24 = sshll.u32 %s1144_s25, 6 }
  0x5f   : > { %458 = vrot.lane.b32.xlu0 %v457_v19, %s989_s18  ;;  %v266_v27 = vcombine.low %v261_v21, %v265_v22  ;;  %v228_v35 = vmul.f32 %v1159_v29, %v226_v20  ;;  %vm404_vm2 = vcmask 261120   ;;  %v389_v45 = vld [vmem:[%s1148_s4 + $0x8] sm:$0xf]  ;;  %vm461_vm3 = vcmask 277504   ;;  %s213_s27 = scalar_lea.vmem [#allocation9], %s720_s24  ;;  %p1282_p11 = scmp.ne.s32.totalorder %s1276_s10, 0 }
  0x60   : > { %362 = vrot.lane.b32.xlu1 %v361_v23, %s990_s20  ;;  %v304_v28 = vcombine.low %v299_v25, %v303_v26  ;;  %v254_v49 = vld [vmem:[%s1148_s4 + $0x8] sm:$0xf]  ;;  %v999_v53 = vmov 0.0   ;;  %vm308_vm4 = vcmask 130048   ;;  %vm342_vm5 = vcmask 908288   ;;  %s619_s30 = sshll.u32 %s213_s27, 4  ;;  %s1214_s30 = int_to_ptr.vmem [resolvable:$true] %s619_s30 }
  0x61   : > { %v230_v36 = vcombine.high %v228_v35, %v228_v35  ;;  %232 = vst [vmem:[#allocation2] sm:$0xf] %v228_v35  ;;  %491 = vst [vmem:[#allocation2 + $0x48] sm:$0xe0] %v999_v53  ;;  %v350_v61 = vld [vmem:[%s1148_s4 + $0x8] sm:$0xf] }
  0x62   : > { %490 = vst [vmem:[#allocation2 + $0x40] sm:$0xe0] %v999_v53  ;;  %vm438_vm6 = vcmask 777216   ;;  %vm270_vm7 = vcmask 15360   ;;  %v293_v4 = vld [vmem:[%s1148_s4 + $0x8] sm:$0xf] }
  0x63   : > { %401 = vrot.lane.b32.xlu0 %v400_v24, %s991_s23  ;;  %233 = vst [vmem:[#allocation2 + $0x8] sm:$0xf] %v230_v36  ;;  %vm246_vm8 = vcmask 1039360   ;;  %v1003_v26 = vmov 0   ;;  %vm476_vm9 = vcmask 769024   ;;  %vm381_vm10 = vcmask 900096  }
  0x64   : > { %267 = vrot.lane.b32.xlu1 %v266_v27, %s992_s26  ;;  %568 = vmatprep.mubr.bf16.mxu0 %v1003_v26  ;;  %vm419_vm11 = vcmask 785408   ;;  %vm324_vm12 = vcmask 916480   ;;  %vm285_vm13 = vcmask 1031168   ;;  %vm529_vm14 = vcmask 1043456   ;;  %s731_s4 = sshll.u32 %s1047_s16, 10  ;;  %s606_s23 = scalar_lea.sflag [#allocation5], %s1144_s25 }
  0x65   : > { %578 = vmatprep.mubr.bf16.mxu1 %v1003_v26  ;;  %vm522_vm15 = vcmask 326656   ;;  %s1219_s16 = scalar_lea.hbm %s1266_s3, %s731_s4  ;;  %s913_s26 = scalar_lea.vmem %s1214_s30, 1024 }
  0x66   : > { %p914_p3 = scmp.ne.s32.totalorder %s1214_s30, %s913_s26 }
  0x67   : > { %305 = vrot.lane.b32.xlu0 %v304_v28, %s993_s28 }
  0x68   : > { %340 = vrot.lane.b32.xlu1 %v332_v30, %s994_s29  ;;  %p915_p1 = pnand %p914_p3, %p1282_p11 }
  0x6a   : > { %p916_p2 = pneg %p915_p1 }
  0x6b   : > { %338 = vrot.lane.b32.xlu0 %v335_v31, %s994_s29 }
  0x6c   : > { %436 = vrot.lane.b32.xlu1 %v829_v32, %s995_s5 }
  0x6f   : > { %434 = vrot.lane.b32.xlu0 %v1159_v29, %s995_s5 }
  0x70   : > { %432 = vrot.lane.b32.xlu1 %v430_v33, %s995_s5 }
  0x73   : > { %336 = vrot.lane.b32.xlu0 %v1159_v29, %s994_s29  ;;  %s1004_s29 = smov [#allocation9]  }
  0x74   : > { %244 = vrot.lane.b32.xlu1 %v830_v34, %s996_s6  ;;  %s917_s5 = sshll.u32 %s1004_s29, 4  ;;  %s918_s5 = int_to_ptr.vmem [resolvable:$false] %s917_s5 }
  0x75   : > { %p920_p6 = scmp.lt.s32.totalorder %s1214_s30, %s918_s5 }
  0x77   : > { %242 = vrot.lane.b32.xlu0 %v1159_v29, %s996_s6 }
  0x7b   : > { %240 = vrot.lane.b32.xlu0 %v430_v33, %s996_s6  ;;  %s919_s6 = scalar_lea.vmem %s918_s5, 2048 }
  0x7c   : > { %p921_p12 = scmp.lt.s32.totalorder %s919_s6, %s913_s26 }
  0x7e   : > { %p922_p7 = por %p921_p12, %p920_p6 }
  0x80   : > { %p923_p9 = pnand %p922_p7, %p916_p2 }
  0xd1   : > { %v459_v37 = vpop.permute.xlu0 %458 }
  0xd2   : > { %v460_v39 = vrot.slane %v459_v37, 4  ;;  %v363_v40 = vpop.permute.xlu1 %362 }
  0xd3   : > { %v364_v41 = vrot.slane %v363_v40, 4 }
  0xd4   : > { %v466_v42 = vmul.f32 %v460_v39, %v446_v38  ;;  %v462_v59 = vsel %vm461_vm3, %v460_v39, %v459_v37 }
  0xd5   : > { %v366_v43 = vsel %vm365_vm1, %v364_v41, %v363_v40  ;;  %v402_v44 = vpop.permute.xlu0 %401  ;;  %v465_v0 = vmul.f32 %v462_v59, %v1159_v29  ;;  %v370_v3 = vmul.f32 %v364_v41, %v350_v61 }
  0xd6   : > { %v1176_v46 = vmul.f32 %v366_v43, %v1159_v29  ;;  %v403_v47 = vrot.slane %v402_v44, 4  ;;  %474 = vrot.lane.b32.xlu1 %v466_v42, %s997_s8  ;;  %v268_v48 = vpop.permute.xlu1 %267 }
  0xd7   : > { %v269_v52 = vrot.slane %v268_v48, 4  ;;  %v469_v6 = vcombine.high %v465_v0, %v465_v0  ;;  %v374_v12 = vcombine.low %v370_v3, %v370_v3 }
  0xd8   : > { %v405_v50 = vsel %vm404_vm2, %v403_v47, %v402_v44  ;;  %v409_v51 = vmul.f32 %v403_v47, %v389_v45  ;;  %377 = vrot.lane.b32.xlu0 %v1176_v46, %s998_s9  ;;  %v373_v22 = vcombine.low %v1176_v46, %v1176_v46 }
  0xd9   : > { %v408_v54 = vmul.f32 %v405_v50, %v1159_v29  ;;  %v306_v55 = vpop.permute.xlu0 %305  ;;  %v275_v56 = vmul.f32 %v269_v52, %v254_v49  ;;  %v271_v9 = vsel %vm270_vm7, %v269_v52, %v268_v48 }
  0xda   : > { %v307_v57 = vrot.slane %v306_v55, 4  ;;  %417 = vrot.lane.b32.xlu1 %v409_v51, %s1000_s21  ;;  %v341_v58 = vpop.permute.xlu1 %340  ;;  %v274_v14 = vmul.f32 %v1159_v29, %v271_v9 }
  0xdb   : > { %v412_v15 = vcombine.high %v408_v54, %v408_v54 }
  0xdc   : > { %v309_v60 = vsel %vm308_vm4, %v307_v57, %v306_v55  ;;  %413 = vrot.lane.b32.xlu0 %v408_v54, %s1000_s21  ;;  %v313_v11 = vmul.f32 %v307_v57, %v293_v4  ;;  %v278_v20 = vcombine.high %v274_v14, %v274_v14 }
  0xdd   : > { %v312_v62 = vmul.f32 %v1159_v29, %v309_v60  ;;  %v339_v63 = vpop.permute.xlu0 %338 }
  0xde   : > { %283 = vrot.lane.b32.xlu1 %v275_v56, %s1001_s17  ;;  %v344_v1 = vsel %vm342_vm5, %v339_v63, %v341_v58  ;;  %v437_v2 = vpop.permute.xlu1 %436  ;;  %v317_v18 = vcombine.low %v313_v11, %v313_v11 }
  0xdf   : > { %348 = vst [vmem:[#allocation2 + $0x28] sm:$0xf] %v344_v1  ;;  %v316_v24 = vcombine.low %v312_v62, %v312_v62 }
  0xe0   : > { %320 = vrot.lane.b32.xlu0 %v312_v62, %s1002_s22 }
  0xe1   : > { %v435_v5 = vpop.permute.xlu0 %434 }
  0xe2   : > { %470 = vrot.lane.b32.xlu1 %v465_v0, %s997_s8  ;;  %v440_v7 = vsel %vm438_vm6, %v435_v5, %v437_v2  ;;  %v433_v8 = vpop.permute.xlu1 %432 }
  0xe3   : > { %444 = vst [vmem:[#allocation2 + $0x38] sm:$0xf0] %v440_v7  ;;  %v439_v10 = vsel %vm438_vm6, %v433_v8, %v435_v5  ;;  %v831_v5 = vld [vmem:[#allocation6] sm:$0xff]  }
  0xe4   : > { %472 = vrot.lane.b32.xlu0 %v469_v6, %s997_s8  ;;  %443 = vst [vmem:[#allocation2 + $0x30] sm:$0xf0] %v439_v10  ;;  %v832_v6 = vld [vmem:[#allocation6 + $0x8] sm:$0xff]  }
  0xe5   : > { %v337_v13 = vpop.permute.xlu0 %336 }
  0xe6   : > { %379 = vrot.lane.b32.xlu1 %v374_v12, %s998_s9  ;;  %v343_v16 = vsel %vm342_vm5, %v337_v13, %v339_v63  ;;  %v245_v17 = vpop.permute.xlu1 %244 }
  0xe7   : > { %347 = vst [vmem:[#allocation2 + $0x20] sm:$0xf] %v343_v16 }
  0xe8   : > { %415 = vrot.lane.b32.xlu0 %v412_v15, %s1000_s21 }
  0xe9   : > { %v243_v19 = vpop.permute.xlu0 %242 }
  0xea   : > { %322 = vrot.lane.b32.xlu1 %v317_v18, %s1002_s22  ;;  %v248_v21 = vsel %vm246_vm8, %v243_v19, %v245_v17 }
  0xeb   : > { %252 = vst [vmem:[#allocation2 + $0x8] sm:$0xf0] %v248_v21 }
  0xec   : > { %281 = vrot.lane.b32.xlu0 %v278_v20, %s1001_s17 }
  0xed   : > { %v241_v23 = vpop.permute.xlu0 %240 }
  0xee   : > { %375 = vrot.lane.b32.xlu1 %v373_v22, %s998_s9  ;;  %v247_v25 = vsel %vm246_vm8, %v241_v23, %v243_v19 }
  0xef   : > { %251 = vst [vmem:[#allocation2] sm:$0xf0] %v247_v25 }
  0xf0   : > { %318 = vrot.lane.b32.xlu0 %v316_v24, %s1002_s22 }
  0xf2   : > { %279 = vrot.lane.b32.xlu1 %v274_v14, %s1001_s17  ;;  %v497_v0 = vld [vmem:[#allocation2 + $0x8] sm:$0xff] }
  0xf6   : > { %v496_v2 = vld [vmem:[#allocation2] sm:$0xff] }
 0x148   : > { %v475_v27 = vpop.permute.xlu1 %474 }
 0x14a   : > { %v378_v28 = vpop.permute.xlu0 %377 }
 0x14c   : > { %v418_v29 = vpop.permute.xlu1 %417 }
 0x14e   : > { %v414_v30 = vpop.permute.xlu0 %413 }
 0x150   : > { %v284_v31 = vpop.permute.xlu1 %283 }
 0x152   : > { %v321_v32 = vpop.permute.xlu0 %320 }
 0x154   : > { %v471_v33 = vpop.permute.xlu1 %470 }
 0x156   : > { %v473_v34 = vpop.permute.xlu0 %472 }
 0x157   : > { %v477_v35 = vsel %vm476_vm9, %v471_v33, %v473_v34  ;;  %v478_v36 = vsel %vm476_vm9, %v473_v34, %v475_v27 }
 0x158   : > { %481 = vst [vmem:[#allocation2 + $0x40] sm:$0xf] %v477_v35  ;;  %482 = vst [vmem:[#allocation2 + $0x48] sm:$0xf] %v478_v36  ;;  %v380_v37 = vpop.permute.xlu1 %379 }
 0x159   : > { %v383_v38 = vsel %vm381_vm10, %v378_v28, %v380_v37 }
 0x15a   : > { %387 = vst [vmem:[#allocation2 + $0x28] sm:$0xf0] %v383_v38  ;;  %v416_v39 = vpop.permute.xlu0 %415 }
 0x15b   : > { %v420_v40 = vsel %vm419_vm11, %v414_v30, %v416_v39  ;;  %v421_v41 = vsel %vm419_vm11, %v416_v39, %v418_v29 }
 0x15c   : > { %424 = vst [vmem:[#allocation2 + $0x30] sm:$0xf] %v420_v40  ;;  %425 = vst [vmem:[#allocation2 + $0x38] sm:$0xf] %v421_v41  ;;  %v323_v42 = vpop.permute.xlu1 %322 }
 0x15d   : > { %v326_v43 = vsel %vm324_vm12, %v321_v32, %v323_v42 }
 0x15e   : > { %330 = vst [vmem:[#allocation2 + $0x18] sm:$0xf0] %v326_v43  ;;  %v282_v44 = vpop.permute.xlu0 %281 }
 0x15f   : > { %v287_v45 = vsel %vm285_vm13, %v282_v44, %v284_v31  ;;  %v505_v46 = vld [vmem:[#allocation2 + $0x48] sm:$0xff]  ;;  %v504_v47 = vld [vmem:[#allocation2 + $0x40] sm:$0xff] }
 0x160   : > { %291 = vst [vmem:[#allocation2 + $0x18] sm:$0xf] %v287_v45  ;;  %v376_v48 = vpop.permute.xlu1 %375  ;;  %v511_v49 = vpack.c.bf16 %v505_v46, %v505_v46  ;;  %v510_v50 = vpack.c.bf16 %v504_v47, %v504_v47 }
 0x161   : > { %v382_v51 = vsel %vm381_vm10, %v376_v48, %v378_v28  ;;  %v501_v52 = vld [vmem:[#allocation2 + $0x28] sm:$0xff] }
 0x162   : > { %386 = vst [vmem:[#allocation2 + $0x20] sm:$0xf0] %v382_v51  ;;  %723 = vmatprep.subr.msk.bf16.mxu0 %vm529_vm14, %v511_v49  ;;  %732 = vmatprep.subr.msk.bf16.mxu1 %vm529_vm14, %v511_v49  ;;  %v319_v53 = vpop.permute.xlu0 %318  ;;  %v531_v54 = vsel %vm529_vm14, %v510_v50, 0 }
 0x163   : > { %v325_v55 = vsel %vm324_vm12, %v319_v53, %v321_v32  ;;  %547 = vmatpush1.bf16.msra.mxu0 %v531_v54  ;;  %735 = vmatpush1.bf16.msra.mxu1 %v531_v54  ;;  %v503_v56 = vld [vmem:[#allocation2 + $0x38] sm:$0xff]  ;;  %v502_v62 = vld [vmem:[#allocation2 + $0x30] sm:$0xff] }
 0x164   : > { %329 = vst [vmem:[#allocation2 + $0x10] sm:$0xf0] %v325_v55  ;;  %v280_v57 = vpop.permute.xlu1 %279  ;;  %v509_v58 = vpack.c.bf16 %v503_v56, %v501_v52 }
 0x165   : > { %v286_v59 = vsel %vm285_vm13, %v280_v57, %v282_v44 }
 0x166   : > { %290 = vst [vmem:[#allocation2 + $0x10] sm:$0xf] %v286_v59  ;;  %548 = vmatprep.subr.bf16.mxu0 %v509_v58  ;;  %733 = vmatprep.subr.bf16.mxu1 %v509_v58 }
 0x167   : > { %v499_v60 = vld [vmem:[#allocation2 + $0x18] sm:$0xff] }
 0x168   : > { %v507_v1 = vpack.c.bf16 %v499_v60, %v497_v0 }
 0x169   : > { %v500_v61 = vld [vmem:[#allocation2 + $0x20] sm:$0xff] }
 0x16a   : > { %v508_v63 = vpack.c.bf16 %v502_v62, %v500_v61 }
 0x16c   : > { %549 = vmatpush1.bf16.msra.mxu0 %v508_v63  ;;  %736 = vmatpush1.bf16.msra.mxu1 %v508_v63 }
 0x16d   : > { %550 = vmatprep.subr.bf16.mxu0 %v507_v1  ;;  %734 = vmatprep.subr.bf16.mxu1 %v507_v1  ;;  %v498_v3 = vld [vmem:[#allocation2 + $0x10] sm:$0xff] }
 0x16e   : > { %v506_v4 = vpack.c.bf16 %v498_v3, %v496_v2 }
 0x170   : > { %551 = vmatpush1.bf16.msra.mxu0 %v506_v4  ;;  %737 = vmatpush1.bf16.msra.mxu1 %v506_v4 }
 0x173   : > { %724 = vmatmul.mubr.msk.bf16.vlgmr.msra.gmra.mxu0 %vm522_vm15, %v831_v5  ;;  %725 = vmatmul.mubr.msk.bf16.vlgmr.msra.gmra.mxu1 %vm522_vm15, %v832_v6 }
 0x233   : > { %v570_v7 = vpop.f32.mrf.mxu0  ;;  %v580_v8 = vpop.f32.mrf.mxu1 }
 0x234   : > { %v589_v9 = vmax.f32 %v570_v7, 0.0  ;;  %v593_v10 = vmax.f32 %v580_v8, 0.0 }
 0x235   : > { %v572_v11 = vpop.f32.mrf.mxu0  ;;  %v582_v12 = vpop.f32.mrf.mxu1 }
 0x236   : > { %597 = vst [vmem:[%s213_s27] sm:$0xff] %v589_v9  ;;  %601 = vst [vmem:[%s213_s27 + $0x20] sm:$0xff] %v593_v10  ;;  %v590_v13 = vmax.f32 %v572_v11, 0.0  ;;  %v594_v14 = vmax.f32 %v582_v12, 0.0 }
 0x237   : > { %v574_v15 = vpop.f32.mrf.mxu0  ;;  %v584_v16 = vpop.f32.mrf.mxu1 }
 0x238   : > { %598 = vst [vmem:[%s213_s27 + $0x8] sm:$0xff] %v590_v13  ;;  %602 = vst [vmem:[%s213_s27 + $0x28] sm:$0xff] %v594_v14  ;;  %v591_v17 = vmax.f32 %v574_v15, 0.0  ;;  %v595_v18 = vmax.f32 %v584_v16, 0.0 }
 0x239   : > { %v576_v19 = vpop.f32.mrf.mxu0  ;;  %v586_v20 = vpop.f32.mrf.mxu1 }
 0x23a   : > { %599 = vst [vmem:[%s213_s27 + $0x10] sm:$0xff] %v591_v17  ;;  %603 = vst [vmem:[%s213_s27 + $0x30] sm:$0xff] %v595_v18  ;;  %v592_v21 = vmax.f32 %v576_v19, 0.0  ;;  %v596_v22 = vmax.f32 %v586_v20, 0.0 }
 0x23c   : > { %600 = vst [vmem:[%s213_s27 + $0x18] sm:$0xff] %v592_v21  ;;  %604 = vst [vmem:[%s213_s27 + $0x38] sm:$0xff] %v596_v22 }
 0x23d   : > { %926 = shalt.err (!%p923_p9)
}
 0x23e   : > { %s927_s8 = scalar_lea.hbm %s1219_s16, 1024  ;;  %s931_s17 = scalar_lea.hbm %s1266_s3, 2048 }
 0x23f   : > { %p928_p13 = scmp.ne.s32.totalorder %s1219_s16, %s927_s8  ;;  %p932_p0 = scmp.lt.s32.totalorder %s1219_s16, %s1266_s3 }
 0x240   : > { %p933_p4 = scmp.lt.s32.totalorder %s931_s17, %s927_s8 }
 0x241   : > { %p929_p5 = pnand %p928_p13, %p1282_p11 }
 0x242   : > { %p934_p8 = por %p933_p4, %p932_p0 }
 0x243   : > { %p930_p10 = pneg %p929_p5 }
 0x245   : > { %p935_p3 = pnand %p934_p8, %p930_p10 }
 0x247   : > { %938 = shalt.err (!%p935_p3)
}
 0x248   : > { %s1005_s27 = smov 256  }
 0x249   : > { %751 = dma.vmem_to_hbm [thread:$0]  (%p1282_p11), %s1214_s30, 1024, %s1219_s16, %s606_s23, %s1005_s27, %s1005_s27, %s993_s28  }
 0x24a PF: > { %s634_s4 = sand.u32 1, %s969_s12   ;;  %p1283_p1 = scmp.ne.s32.totalorder %s1272_s19, 0 }
 0x24b   : > { %p1284_p2 = scmp.ge.s32.totalorder %s981_s15, 2  ;;  %s635_s18 = scalar_lea.sflag [#allocation5], %s634_s4 }
 0x24d   : > { %p765_p6 = pnand %p1284_p2, %p1283_p1 }
 0x24f   : > { %p766_p12 = pneg %p765_p6 }
 0x251   : > { %964 = dma.done.wait (%p766_p12), %s635_s18, 1024  }
 0x252   : > { %966 = vsyncadd (%p766_p12), %s635_s18, 4294966272  ;;  %p17_p7 = scmp.ge.s32.totalorder %s1098_s7, 4   ;;  %s1285_s12 = smov %s973_s13 }
 0x253   : > { %s1286_s13 = smov %s977_s14  ;;  %s1287_s14 = smov %s1114_s11 }
 0x254   : > { %s1288_s15 = smov %s1098_s7  ;;  %19 = sbr.rel (!%p17_p7) target bundleno = 6 (0x6), region = 87 }
 0x259   :  { %640 = vsyncpa [#allocation4], 1 }
 0x25a   :  { %642 = vsyncpa [#allocation4 + $0x1], 1 }
 0x25b   :  { %643 = vsyncpa [#allocation7], 1 }
 0x25c   :  { %644 = vsyncpa [#allocation5], 1 }
 0x25d   :  { %646 = vsyncpa [#allocation5 + $0x1], 1 }

</bundles_post_ra>
